<compile_context>
chip_gen: v5e
topology: v5e:2x2
jax: 0.10.0
libtpu: 0.0.40
codegen_flags: <defaults>
</compile_context>

<pallas_src>
import math

import jax
import jax.numpy as jnp
from jax.experimental import pallas as pl
from jax.experimental.pallas import tpu as pltpu


def _pick_tile(s, candidates):
    for t in candidates:
        if t <= s and s % t == 0:
            return t
    return s


def se_block_pallas(x, fc1_w, fc2_w):
    """SE block forward.

    x:      (B, C, H, W) float32
    fc1_w:  (C//ratio, C)  float32   (PyTorch Linear(C, C//ratio).weight)
    fc2_w:  (C, C//ratio)  float32   (PyTorch Linear(C//ratio, C).weight)
    """
    B, C, H, W = x.shape
    hidden = fc1_w.shape[0]
    S = H * W
    xf = x.reshape(B, C, S)                       # lane-dense spatial view

    ts1 = _pick_tile(S, (2048, 1024, 512, 256, 128))   # pooling pass tile
    ts2 = _pick_tile(S, (1024, 512, 256, 128))         # scale pass tile
    inv_hw = 1.0 / float(S)

    # ---------------- pass 1: pool -> MLP -> sigmoid -> attn (B, C, 1) -------
    def attn_kernel(x_ref, w1_ref, w2_ref, attn_ref, acc_ref):
        # x_ref: (1, C, ts1); w1_ref: (hidden, C); w2_ref: (C, hidden)
        # attn_ref: (1, C, 1); acc_ref: VMEM (C, 1) f32
        s = pl.program_id(1)

        @pl.when(s == 0)
        def _():
            acc_ref[...] = jnp.zeros_like(acc_ref)

        # single lane-reduction per tile; channels live on sublanes
        acc_ref[...] += jnp.sum(x_ref[0], axis=-1, keepdims=True)

        @pl.when(s == pl.num_programs(1) - 1)
        def _():
            pooled = acc_ref[...] * inv_hw                               # (C, 1)
            h = jnp.dot(w1_ref[...], pooled,
                        preferred_element_type=jnp.float32)              # (hidden, 1)
            h = jnp.maximum(h, 0.0)
            a = jnp.dot(w2_ref[...], h,
                        preferred_element_type=jnp.float32)              # (C, 1)
            attn_ref[...] = jax.nn.sigmoid(a)[None]                      # (1, C, 1)

    attn = pl.pallas_call(
        attn_kernel,
        out_shape=jax.ShapeDtypeStruct((B, C, 1), jnp.float32),
        grid_spec=pltpu.PrefetchScalarGridSpec(
            num_scalar_prefetch=0,
            grid=(B, S // ts1),
            in_specs=[
                pl.BlockSpec((1, C, ts1), lambda b, s: (b, 0, s)),
                pl.BlockSpec((hidden, C), lambda b, s: (0, 0)),
                pl.BlockSpec((C, hidden), lambda b, s: (0, 0)),
            ],
            out_specs=pl.BlockSpec((1, C, 1), lambda b, s: (b, 0, 0)),
            scratch_shapes=[pltpu.VMEM((C, 1), jnp.float32)],
        ),
        compiler_params=pltpu.CompilerParams(
            dimension_semantics=("parallel", "arbitrary"),
            vmem_limit_bytes=32 * 1024 * 1024),
    )(xf, fc1_w, fc2_w)

    # ---------------- pass 2: broadcasted per-channel scale ------------------
    def scale_kernel(x_ref, a_ref, o_ref):
        # x_ref: (1, C, ts2); a_ref: (1, C, 1) -> broadcast over lanes
        o_ref[...] = x_ref[...] * a_ref[...]

    out = pl.pallas_call(
        scale_kernel,
        out_shape=jax.ShapeDtypeStruct((B, C, S), x.dtype),
        grid_spec=pltpu.PrefetchScalarGridSpec(
            num_scalar_prefetch=0,
            grid=(B, S // ts2),
            in_specs=[
                pl.BlockSpec((1, C, ts2), lambda b, s: (b, 0, s)),
                pl.BlockSpec((1, C, 1), lambda b, s: (b, 0, 0)),
            ],
            out_specs=pl.BlockSpec((1, C, ts2), lambda b, s: (b, 0, s)),
        ),
        compiler_params=pltpu.CompilerParams(
            dimension_semantics=("parallel", "parallel"),
            vmem_limit_bytes=32 * 1024 * 1024),
    )(xf, attn)

    return out.reshape(B, C, H, W)


def se_block_reference(x, fc1_w, fc2_w):
    """Pure-JAX reference matching the PyTorch se_block."""
    pooled = jnp.mean(x, axis=(2, 3))                      # (B, C)
    h = jnp.maximum(pooled @ fc1_w.T, 0.0)                 # (B, hidden)
    attn = jax.nn.sigmoid(h @ fc2_w.T)                     # (B, C)
    return x * attn[:, :, None, None]


if __name__ == "__main__":
    # Small shapes consistent with the module: ratio=16 needs C >= 16, pick C=32.
    B, C, H, W = 2, 32, 16, 16
    ratio = 16
    hidden = max(C // ratio, 1)                            # -> 2

    key = jax.random.PRNGKey(0)
    kx, k1, k2 = jax.random.split(key, 3)
    x = jax.random.normal(kx, (B, C, H, W), dtype=jnp.float32)

    # PyTorch-style Linear(bias=False) weight init (uniform +/- 1/sqrt(fan_in)).
    b1 = 1.0 / math.sqrt(C)
    fc1_w = jax.random.uniform(k1, (hidden, C), jnp.float32, minval=-b1, maxval=b1)
    b2 = 1.0 / math.sqrt(hidden)
    fc2_w = jax.random.uniform(k2, (C, hidden), jnp.float32, minval=-b2, maxval=b2)

    out = se_block_pallas(x, fc1_w, fc2_w)
    out = jax.block_until_ready(out)

    ref = se_block_reference(x, fc1_w, fc2_w)
    assert out.shape == x.shape
    assert jnp.allclose(out, ref, atol=1e-5, rtol=1e-5), "mismatch vs reference"
    print("KERNEL_OK")
</pallas_src>

<mosaic_0001>
module attributes {stable_mosaic.version = 11 : i64} {
  func.func @attn_kernel(%arg0: i32, %arg1: i32, %arg2: memref<1x32x256xf32, #tpu.memory_space<vmem>>, %arg3: memref<2x32xf32, #tpu.memory_space<vmem>>, %arg4: memref<32x2xf32, #tpu.memory_space<vmem>>, %arg5: memref<1x32x1xf32, #tpu.memory_space<vmem>>, %arg6: memref<32x1xf32, #tpu.memory_space<vmem>>) attributes {dimension_semantics = [#tpu.dimension_semantics<parallel>, #tpu.dimension_semantics<arbitrary>], iteration_bounds = array<i64: 2, 1>, scalar_prefetch = 0 : i64, scratch_operands = 1 : i64, tpu.core_type = #tpu.core_type<tc>, window_params = [{transform_indices = @transform_0, window_bounds = array<i64: 1, 32, 256>}, {pipeline_mode = #tpu.pipeline_mode<synchronous>, transform_indices = @transform_1, window_bounds = array<i64: 2, 32>}, {pipeline_mode = #tpu.pipeline_mode<synchronous>, transform_indices = @transform_2, window_bounds = array<i64: 32, 2>}, {transform_indices = @transform_3, window_bounds = array<i64: 1, 32, 1>}]} {
    %c0_i32 = arith.constant 0 : i32
    %0 = arith.cmpi eq, %arg1, %c0_i32 : i32
    %1 = arith.extui %0 : i1 to i32
    %c0_i32_0 = arith.constant 0 : i32
    %2 = arith.cmpi ne, %1, %c0_i32_0 : i32
    scf.if %2 {
      %cst_9 = arith.constant 0.000000e+00 : f32
      %13 = vector.broadcast %cst_9 : f32 to vector<32x1xf32>
      %c0_10 = arith.constant 0 : index
      %c0_11 = arith.constant 0 : index
      %14 = vector.load %arg6[%c0_10, %c0_11] : memref<32x1xf32, #tpu.memory_space<vmem>>, vector<32x1xf32>
      tpu.vector_store %arg6[%c0_10, %c0_11], %13 {strides = array<i32>} : memref<32x1xf32, #tpu.memory_space<vmem>>, vector<32x1xf32>,
    } else {
    }
    %c0 = arith.constant 0 : index
    %c0_1 = arith.constant 0 : index
    %3 = vector.load %arg6[%c0, %c0_1] : memref<32x1xf32, #tpu.memory_space<vmem>>, vector<32x1xf32>
    %c0_2 = arith.constant 0 : index
    %c0_3 = arith.constant 0 : index
    %c0_4 = arith.constant 0 : index
    %4 = vector.load %arg2[%c0_2, %c0_3, %c0_4] : memref<1x32x256xf32, #tpu.memory_space<vmem>>, vector<1x32x256xf32>
    %5 = vector.shape_cast %4 : vector<1x32x256xf32> to vector<32x256xf32>
    %cst = arith.constant dense<0.000000e+00> : vector<32xf32>
    %6 = vector.multi_reduction <add>, %5, %cst [1] : vector<32x256xf32> to vector<32xf32>
    %7 = vector.shape_cast %6 : vector<32xf32> to vector<32x1xf32>
    %8 = arith.addf %3, %7 : vector<32x1xf32>
    %c0_5 = arith.constant 0 : index
    %c0_6 = arith.constant 0 : index
    %9 = vector.load %arg6[%c0_5, %c0_6] : memref<32x1xf32, #tpu.memory_space<vmem>>, vector<32x1xf32>
    tpu.vector_store %arg6[%c0_5, %c0_6], %8 {strides = array<i32>} : memref<32x1xf32, #tpu.memory_space<vmem>>, vector<32x1xf32>,
    %c0_i32_7 = arith.constant 0 : i32
    %10 = arith.cmpi eq, %arg1, %c0_i32_7 : i32
    %11 = arith.extui %10 : i1 to i32
    %c0_i32_8 = arith.constant 0 : i32
    %12 = arith.cmpi ne, %11, %c0_i32_8 : i32
    scf.if %12 {
      %c0_9 = arith.constant 0 : index
      %c0_10 = arith.constant 0 : index
      %13 = vector.load %arg6[%c0_9, %c0_10] : memref<32x1xf32, #tpu.memory_space<vmem>>, vector<32x1xf32>
      %cst_11 = arith.constant 3.906250e-03 : f32
      %14 = vector.broadcast %cst_11 : f32 to vector<32x1xf32>
      %15 = arith.mulf %13, %14 : vector<32x1xf32>
      %c0_12 = arith.constant 0 : index
      %c0_13 = arith.constant 0 : index
      %16 = vector.load %arg3[%c0_12, %c0_13] : memref<2x32xf32, #tpu.memory_space<vmem>>, vector<2x32xf32>
      %cst_14 = arith.constant dense<0.000000e+00> : vector<2x1xf32>
      %17 = tpu.matmul %16, %15, %cst_14 {dimension_numbers = #tpu.dot_dimension_numbers<[1], [0], [0], [1], [0, 0, 1, 1], [], []>} : vector<2x32xf32>, vector<32x1xf32>, vector<2x1xf32> -> vector<2x1xf32>
      %cst_15 = arith.constant 0.000000e+00 : f32
      %18 = vector.broadcast %cst_15 : f32 to vector<2x1xf32>
      %19 = arith.maximumf %17, %18 : vector<2x1xf32>
      %c0_16 = arith.constant 0 : index
      %c0_17 = arith.constant 0 : index
      %20 = vector.load %arg4[%c0_16, %c0_17] : memref<32x2xf32, #tpu.memory_space<vmem>>, vector<32x2xf32>
      %cst_18 = arith.constant dense<0.000000e+00> : vector<32x1xf32>
      %21 = tpu.matmul %20, %19, %cst_18 {dimension_numbers = #tpu.dot_dimension_numbers<[1], [0], [0], [1], [0, 0, 1, 1], [], []>} : vector<32x2xf32>, vector<2x1xf32>, vector<32x1xf32> -> vector<32x1xf32>
      %22 = arith.negf %21 : vector<32x1xf32>
      %23 = math.exp %22 : vector<32x1xf32>
      %cst_19 = arith.constant 1.000000e+00 : f32
      %24 = vector.broadcast %cst_19 : f32 to vector<32x1xf32>
      %25 = arith.addf %24, %23 : vector<32x1xf32>
      %26 = arith.divf %24, %25 : vector<32x1xf32>
      %27 = vector.shape_cast %26 : vector<32x1xf32> to vector<1x32x1xf32>
      %c0_20 = arith.constant 0 : index
      %c0_21 = arith.constant 0 : index
      %c0_22 = arith.constant 0 : index
      %28 = vector.load %arg5[%c0_20, %c0_21, %c0_22] : memref<1x32x1xf32, #tpu.memory_space<vmem>>, vector<1x32x1xf32>
      tpu.vector_store %arg5[%c0_20, %c0_21, %c0_22], %27 {strides = array<i32>} : memref<1x32x1xf32, #tpu.memory_space<vmem>>, vector<1x32x1xf32>,
    } else {
    }
    return
  }
  func.func @transform_0(%arg0: i32, %arg1: i32) -> (i32, i32, i32) {
    %c0_i32 = arith.constant 0 : i32
    %c0_i32_0 = arith.constant 0 : i32
    return %arg0, %c0_i32, %arg1 : i32, i32, i32
  }
  func.func @transform_1(%arg0: i32, %arg1: i32) -> (i32, i32) {
    %c0_i32 = arith.constant 0 : i32
    %c0_i32_0 = arith.constant 0 : i32
    %c0_i32_1 = arith.constant 0 : i32
    return %c0_i32, %c0_i32_0 : i32, i32
  }
  func.func @transform_2(%arg0: i32, %arg1: i32) -> (i32, i32) {
    %c0_i32 = arith.constant 0 : i32
    %c0_i32_0 = arith.constant 0 : i32
    %c0_i32_1 = arith.constant 0 : i32
    return %c0_i32, %c0_i32_0 : i32, i32
  }
  func.func @transform_3(%arg0: i32, %arg1: i32) -> (i32, i32, i32) {
    %c0_i32 = arith.constant 0 : i32
    %c0_i32_0 = arith.constant 0 : i32
    %c0_i32_1 = arith.constant 0 : i32
    return %arg0, %c0_i32, %c0_i32_0 : i32, i32, i32
  }
}

</mosaic_0001>

<bundles_post_ra>
// kernel: tpu_custom_call.1
= control target key start
LH: loop header
LB: loop body
LE: loop exit
PB: predicated region body
PF: predicated region fallthrough
CT: control target
= control target key end

     0   :  { %8 = vsyncpa [#allocation4], 0  ;;  %s824_s0 = inlined_call_operand.hbm [shape: f32[2,32,256], index: 0, kind: input, shape index: {}]   ;;  %s825_s1 = inlined_call_operand.vmem [shape: f32[2,32], index: 1, kind: input, shape index: {}]   ;;  %s826_s2 = inlined_call_operand.vmem [shape: f32[32,2], index: 2, kind: input, shape index: {}]   ;;  %s827_s3 = inlined_call_operand.vmem [shape: f32[2,32,1], index: 3, kind: output, shape index: {}]  }
   0x1   :  { %10 = vsyncpa [#allocation4 + $0x1], 0  ;;  %s703_s12 = smov 0   ;;  %s705_s13 = smov 0  }
   0x2   :  { %s707_s14 = smov 0   ;;  %s709_s15 = smov 0  }
   0x3   :  { %s711_s16 = smov 0   ;;  %s713_s17 = smov 0  }
   0x4 LB: > { %s497_s18 = sadd.s32 4294967295, %s678_s17   ;;  %s28_s19 = sadd.s32 1, %s674_s16  ;;  %s678_s17 = sphi %s713_s17, %s16_s17   ;;  %s674_s16 = sphi %s711_s16, %s834_s16   ;;  %s670_s15 = sphi %s709_s15, %s833_s15   ;;  %s666_s14 = sphi %s707_s14, %s832_s14   ;;  %s662_s13 = sphi %s705_s13, %s831_s13   ;;  %s658_s12 = sphi %s703_s12, %s830_s12  }
   0x5   : > { %p30_p0 = scmp.ge.s32.totalorder %s28_s19, 2  ;;  %s37_s20 = sadd.s32 1, %s666_s14 }
   0x6   : > { %p44_p1 = scmp.ne.s32.totalorder %s666_s14, %s662_s13  ;;  %p45_p2 = scmp.eq.s32.totalorder %s678_s17, 0 }
   0x7   : > { %s836_s19 = smov (%p30_p0, %s28_s19), 0  ;;  %p50_p4 = scmp.ne.s32.totalorder %s662_s13, %s658_s12 }
   0x8   : > { %p739_p3 = por %p45_p2, %p44_p1  ;;  %s32_s22 = ssub.s32 %s674_s16, %s836_s19 }
   0x9   : > { %p51_p5 = scmp.eq.s32.totalorder %s497_s18, 0  ;;  %p35_p6 = scmp.eq.s32.totalorder %s32_s22, 0 }
   0xa   : > { %p530_p8 = scmp.lt.s32.totalorder %s678_s17, 2  ;;  %s148_s25 = sand.u32 1, %s666_s14  }
   0xb   : > { %p746_p7 = por %p51_p5, %p50_p4  ;;  %s520_s26 = sshll.u32 %s674_s16, 6 }
   0xc   : > { %s752_s24 = scalar_select %p35_p6, %s666_s14, %s37_s20  }
   0xd   : > { %s501_s27 = sshll.u32 %s148_s25, 6  ;;  %s159_s30 = scalar_lea.hbm %s824_s0, %s520_s26 }
   0xe   : > { %s160_s4 = sshll.u32 %s159_s30, 4  ;;  %s152_s5 = scalar_lea.vmem [#allocation3], %s501_s27  ;;  %s161_s4 = int_to_ptr.hbm [resolvable:$true] %s160_s4 }
   0xf   : > { %s162_s6 = sshll.u32 %s152_s5, 4  ;;  %p527_p9 = pnand %p530_p8, %p739_p3  ;;  %s163_s6 = int_to_ptr.vmem [resolvable:$true] %s162_s6 }
  0x10   : > { %p504_p10 = scmp.ge.s32.totalorder %s678_s17, 1  ;;  %p170_p11 = scmp.lt.s32.totalorder %s678_s17, 3 }
  0x11   : > { %s149_s7 = scalar_lea.sflag [#allocation4], %s148_s25  ;;  %s680_s8 = smov 256  }
  0x12   : > { %s681_s9 = smov 16   ;;  %p171_p12 = pnand %p504_p10, %p170_p11 }
  0x13   : > { %529 = dma.hbm_to_vmem [thread:$0]  (!%p527_p9), %s161_s4, 1024, %s163_s6, %s149_s7, %s680_s8, %s680_s8, %s681_s9  }
  0x14   : > { %174 = sbr.rel (%p171_p12) target bundleno = 468 (0x1d4), region = 32  ;;  %s176_s10 = sand.u32 (!%p171_p12), 1, %s662_s13  }
  0x15   : > { %s505_s11 = sshll.u32 (!%p171_p12), %s176_s10, 6  ;;  %s177_s12 = scalar_lea.sflag (!%p171_p12), [#allocation4], %s176_s10 }
  0x16   : > { %s180_s18 = scalar_lea.vmem (!%p171_p12), [#allocation3], %s505_s11 }
  0x19   : > { %653 = dma.done.wait (%p746_p7), %s177_s12, 1024  }
  0x1a   : > { %655 = vsyncadd (%p746_p7), %s177_s12, 4294966272  ;;  %vm214_vm0 = vcmask 7168   ;;  %v682_v0 = vmov 0.0   ;;  %v229_v1 = vld [vmem:[%s180_s18 + $0x30] sm:$0xff]  ;;  %v230_v2 = vld [vmem:[%s180_s18 + $0x38] sm:$0xff]  ;;  %vm264_vm1 = vcmask 261120  }
  0x1b   : > { %218 = vst.msk [vmem:[#allocation2 + $0x18] sm:$0xff] %vm214_vm0, %v682_v0  ;;  %v225_v3 = vld [vmem:[%s180_s18 + $0x10] sm:$0xff]  ;;  %v240_v4 = vadd.f32 %v230_v2, %v229_v1  ;;  %v226_v5 = vld [vmem:[%s180_s18 + $0x18] sm:$0xff]  ;;  %v227_v7 = vld [vmem:[%s180_s18 + $0x20] sm:$0xff]  ;;  %vm306_vm2 = vcmask 1041408   ;;  %vm293_vm3 = vcmask 15360  }
  0x1c   : > { %215 = vst.msk [vmem:[#allocation2] sm:$0xff] %vm214_vm0, %v682_v0  ;;  %v234_v6 = vadd.f32 %v226_v5, %v225_v3  ;;  %v228_v8 = vld [vmem:[%s180_s18 + $0x28] sm:$0xff]  ;;  %v223_v9 = vld [vmem:[%s180_s18] sm:$0xff]  ;;  %v292_v37 = vld [vmem:[%s826_s2 + $0x18] sm:$0xff]  ;;  %p205_p13 = scmp.lt.s32.totalorder %s670_s15, 1 }
  0x1d   : > { %216 = vst.msk [vmem:[#allocation2 + $0x8] sm:$0xff] %vm214_vm0, %v682_v0  ;;  %241 = vadd.xlane.f32.xlu0 %v240_v4  ;;  %v224_v10 = vld [vmem:[%s180_s18 + $0x8] sm:$0xff]  ;;  %v237_v11 = vadd.f32 %v228_v8, %v227_v7  ;;  %v263_v33 = vld [vmem:[%s825_s1] sm:$0x3]  ;;  %v291_v39 = vld [vmem:[%s826_s2 + $0x10] sm:$0xff] }
  0x1e   : > { %217 = vst.msk [vmem:[#allocation2 + $0x10] sm:$0xff] %vm214_vm0, %v682_v0  ;;  %235 = vadd.xlane.f32.xlu1 %v234_v6  ;;  %v231_v12 = vadd.f32 %v224_v10, %v223_v9  ;;  %v290_v36 = vld [vmem:[%s826_s2 + $0x8] sm:$0xff]  ;;  %v289_v38 = vld [vmem:[%s826_s2] sm:$0xff]  ;;  %s838_s15 = smov (!%p205_p13, %s670_s15), 1 }
  0x1f   : > { %s521_s4 = sshll.u32 %s838_s15, 5 }
  0x20   : > { %s796_s7 = scalar_lea.vmem %s827_s3, %s521_s4 }
  0x22   : > { %v222_v13 = vld [vmem:[#allocation2 + $0x18] sm:$0xff] }
  0x23   : > { %v219_v20 = vld [vmem:[#allocation2] sm:$0xff] }
  0x24   : > { %v220_v14 = vld [vmem:[#allocation2 + $0x8] sm:$0xff] }
  0x25   : > { %238 = vadd.xlane.f32.xlu0 %v237_v11  ;;  %v221_v19 = vld [vmem:[#allocation2 + $0x10] sm:$0xff] }
  0x26   : > { %232 = vadd.xlane.f32.xlu1 %v231_v12 }
  0x90   : > { %v242_v15 = vpop.xlane.xlu0 %241 }
  0x91   : > { %v246_v16 = vadd.f32 %v242_v15, %v222_v13  ;;  %v236_v17 = vpop.xlane.xlu1 %235 }
  0x92   : > { %v244_v18 = vadd.f32 %v236_v17, %v220_v14 }
  0x93   : > { %251 = vst.msk [vmem:[#allocation2 + $0x18] sm:$0xff] %vm214_vm0, %v246_v16 }
  0x94   : > { %249 = vst.msk [vmem:[#allocation2 + $0x8] sm:$0xff] %vm214_vm0, %v244_v18 }
  0x98   : > { %v239_v21 = vpop.xlane.xlu0 %238 }
  0x99   : > { %v245_v22 = vadd.f32 %v239_v21, %v221_v19  ;;  %v233_v23 = vpop.xlane.xlu1 %232 }
  0x9a   : > { %v243_v24 = vadd.f32 %v233_v23, %v219_v20  ;;  %v258_v25 = vld [vmem:[#allocation2 + $0x18] sm:$0xff] }
  0x9b   : > { %250 = vst.msk [vmem:[#allocation2 + $0x10] sm:$0xff] %vm214_vm0, %v245_v22  ;;  %v262_v26 = vmul.f32 0.00390625, %v258_v25  ;;  %v256_v28 = vld [vmem:[#allocation2 + $0x8] sm:$0xff] }
  0x9c   : > { %248 = vst.msk [vmem:[#allocation2] sm:$0xff] %vm214_vm0, %v243_v24  ;;  %v260_v31 = vmul.f32 0.00390625, %v256_v28 }
  0x9d   : > { %280 = vmatpush.msra.mxu0 %v262_v26 }
  0xa2   : > { %v257_v27 = vld [vmem:[#allocation2 + $0x10] sm:$0xff] }
  0xa3   : > { %v261_v29 = vmul.f32 0.00390625, %v257_v27  ;;  %v255_v30 = vld [vmem:[#allocation2] sm:$0xff] }
  0xa4   : > { %v259_v32 = vmul.f32 0.00390625, %v255_v30 }
  0xa5   : > { %281 = vmatpush.msra.mxu0 %v261_v29 }
  0xa7   : > { %282 = vmatpush.msra.mxu0 %v260_v31 }
  0xa9   : > { %283 = vmatpush.msra.mxu0 %v259_v32 }
  0xaa   : > { %508 = vmatmul.msk.f32.vlgmr.msra.gmra.mxu0 %vm264_vm1, %v263_v33 }
 0x127   : > { %v285_v34 = vpop.f32.mrf.mxu0 }
 0x128   : > { %v288_v35 = vmax.f32 %v285_v34, 0.0 }
 0x12a   : > { %509 = vmatpush.msk.msra.mxu1 %vm306_vm2, %v288_v35  ;;  %522 = vmatpush.msk.msra.mxu2 %vm306_vm2, %v288_v35 }
 0x12b   : > { %523 = vmatpush.msk.msra.mxu3 %vm306_vm2, %v288_v35  ;;  %511 = vmatmul.msk.f32.vlgmr.msra.gmra.mxu2 %vm293_vm3, %v290_v36 }
 0x12c   : > { %513 = vmatmul.msk.f32.vlgmr.msra.gmra.mxu3 %vm293_vm3, %v292_v37  ;;  %510 = vmatmul.msk.f32.vlgmr.msra.gmra.mxu1 %vm293_vm3, %v289_v38 }
 0x133   : > { %512 = vmatmul.msk.f32.gmra.mxu2 %vm293_vm3, %v291_v39 }
 0x1a9   : > { %v327_v40 = vpop.f32.mrf.mxu1 }
 0x1aa   : > { %v514_v41 = vmul.f32 -1.442695, %v327_v40 }
 0x1ac   : > { %582 = vpow2.f32 %v514_v41 }
 0x1ae   : > { %v330_v42 = vpop.f32.mrf.mxu2 }
 0x1af   : > { %v515_v43 = vmul.f32 -1.442695, %v330_v42  ;;  %v336_v44 = vpop.f32.mrf.mxu3 }
 0x1b0   : > { %v517_v45 = vmul.f32 -1.442695, %v336_v44 }
 0x1b1   : > { %584 = vpow2.f32 %v515_v43 }
 0x1b2   : > { %v583_v46 = vpop.eup %582  ;;  %586 = vpow2.f32 %v517_v45 }
 0x1b3   : > { %v351_v47 = vadd.f32 1.0, %v583_v46 }
 0x1b5   : > { %588 = vrcp.f32 %v351_v47  ;;  %v366_v56 = vand.u32 2147483648, %v351_v47  ;;  %vm360_vm4 = vweird.f32 %v351_v47  ;;  %v364_v58 = vand.u32 2147483647, %v351_v47 }
 0x1b6   : > { %v333_v48 = vpop.f32.mrf.mxu2 }
 0x1b7   : > { %v585_v49 = vpop.eup %584  ;;  %v516_v50 = vmul.f32 -1.442695, %v333_v48  ;;  %v367_v0 = vor.u32 1.1754944e-38, %v366_v56  ;;  %vm365_vm7 = vcmp.eq.f32.partialorder %v364_v58, 8.507059e+37 }
 0x1b8   : > { %v587_v51 = vpop.eup %586  ;;  %v352_v52 = vadd.f32 1.0, %v585_v49 }
 0x1b9   : > { %v354_v53 = vadd.f32 1.0, %v587_v51  ;;  %590 = vpow2.f32 %v516_v50 }
 0x1ba   : > { %592 = vrcp.f32 %v352_v52  ;;  %v379_v6 = vand.u32 2147483647, %v352_v52  ;;  %v381_v7 = vand.u32 2147483648, %v352_v52  ;;  %vm375_vm11 = vweird.f32 %v352_v52 }
 0x1bb   : > { %v589_v54 = vpop.eup %588  ;;  %594 = vrcp.f32 %v354_v53  ;;  %v411_v11 = vand.u32 2147483648, %v354_v53  ;;  %vm405_vm9 = vweird.f32 %v354_v53  ;;  %v409_v13 = vand.u32 2147483647, %v354_v53 }
 0x1bc   : > { %v356_v55 = vmul.f32 %v589_v54, %v351_v47  ;;  %vm361_vm5 = vweird.f32 %v589_v54  ;;  %v382_v16 = vor.u32 1.1754944e-38, %v381_v7  ;;  %vm380_vm13 = vcmp.eq.f32.partialorder %v379_v6, 8.507059e+37 }
 0x1bd   : > { %vm362_vm6 = vmor %vm360_vm4, %vm361_vm5  ;;  %v412_v19 = vor.u32 1.1754944e-38, %v411_v11  ;;  %vm410_vm15 = vcmp.eq.f32.partialorder %v409_v13, 8.507059e+37 }
 0x1be   : > { %v357_v57 = vsub.f32 1.0, %v356_v55 }
 0x1bf   : > { %v591_v59 = vpop.eup %590 }
 0x1c0   : > { %v593_v60 = vpop.eup %592  ;;  %v358_v61 = vmul.f32 %v589_v54, %v357_v57  ;;  %v353_v62 = vadd.f32 1.0, %v591_v59 }
 0x1c1   : > { %v595_v63 = vpop.eup %594  ;;  %v371_v1 = vmul.f32 %v593_v60, %v352_v52  ;;  %vm376_vm8 = vweird.f32 %v593_v60 }
 0x1c2   : > { %v359_v2 = vadd.f32 %v589_v54, %v358_v61  ;;  %v401_v3 = vmul.f32 %v595_v63, %v354_v53  ;;  %596 = vrcp.f32 %v353_v62  ;;  %vm406_vm10 = vweird.f32 %v595_v63  ;;  %vm377_vm12 = vmor %vm375_vm11, %vm376_vm8 }
 0x1c3   : > { %v372_v4 = vsub.f32 1.0, %v371_v1  ;;  %vm407_vm14 = vmor %vm405_vm9, %vm406_vm10  ;;  %v396_v25 = vand.u32 2147483648, %v353_v62  ;;  %v394_v27 = vand.u32 2147483647, %v353_v62  ;;  %vm390_vm2 = vweird.f32 %v353_v62 }
 0x1c4   : > { %v363_v5 = vsel %vm362_vm6, %v589_v54, %v359_v2  ;;  %v402_v8 = vsub.f32 1.0, %v401_v3 }
 0x1c5   : > { %v368_v9 = vsel %vm365_vm7, %v367_v0, %v363_v5  ;;  %v373_v10 = vmul.f32 %v593_v60, %v372_v4  ;;  %v397_v29 = vor.u32 1.1754944e-38, %v396_v25  ;;  %vm395_vm4 = vcmp.eq.f32.partialorder %v394_v27, 8.507059e+37 }
 0x1c6   : > { %415 = vst.msk [vmem:[%s796_s7] sm:$0xff] %vm214_vm0, %v368_v9  ;;  %v403_v12 = vmul.f32 %v595_v63, %v402_v8 }
 0x1c7   : > { %v374_v14 = vadd.f32 %v593_v60, %v373_v10 }
 0x1c8   : > { %v597_v15 = vpop.eup %596  ;;  %v404_v17 = vadd.f32 %v595_v63, %v403_v12 }
 0x1c9   : > { %v378_v18 = vsel %vm377_vm12, %v593_v60, %v374_v14  ;;  %v386_v20 = vmul.f32 %v597_v15, %v353_v62  ;;  %vm391_vm1 = vweird.f32 %v597_v15 }
 0x1ca   : > { %v383_v21 = vsel %vm380_vm13, %v382_v16, %v378_v18  ;;  %v408_v22 = vsel %vm407_vm14, %v595_v63, %v404_v17  ;;  %vm392_vm3 = vmor %vm390_vm2, %vm391_vm1 }
 0x1cb   : > { %416 = vst.msk [vmem:[%s796_s7 + $0x8] sm:$0xff] %vm214_vm0, %v383_v21  ;;  %v413_v23 = vsel %vm410_vm15, %v412_v19, %v408_v22  ;;  %v387_v24 = vsub.f32 1.0, %v386_v20 }
 0x1cc   : > { %418 = vst.msk [vmem:[%s796_s7 + $0x18] sm:$0xff] %vm214_vm0, %v413_v23 }
 0x1cd   : > { %v388_v26 = vmul.f32 %v597_v15, %v387_v24 }
 0x1cf   : > { %v389_v28 = vadd.f32 %v597_v15, %v388_v26 }
 0x1d1   : > { %v393_v30 = vsel %vm392_vm3, %v597_v15, %v389_v28 }
 0x1d2   : > { %v398_v31 = vsel %vm395_vm4, %v397_v29, %v393_v30 }
 0x1d3   : > { %417 = vst.msk [vmem:[%s796_s7 + $0x10] sm:$0xff] %vm214_vm0, %v398_v31 }
 0x1d4 PF: > { %s16_s17 = sadd.s32 1, %s678_s17   ;;  %s830_s12 = smov %s662_s13 }
 0x1d5   : > { %p13_p0 = scmp.ge.s32.totalorder %s16_s17, 4   ;;  %s831_s13 = smov %s666_s14 }
 0x1d6   : > { %s832_s14 = smov %s752_s24  ;;  %s833_s15 = smov %s674_s16 }
 0x1d7   : > { %s834_s16 = smov %s836_s19  ;;  %15 = sbr.rel (!%p13_p0) target bundleno = 4 (0x4), region = 80 }
 0x1dc   :  { %440 = vsyncpa [#allocation4], 1 }
 0x1dd   :  { %442 = vsyncpa [#allocation4 + $0x1], 1 }

</bundles_post_ra>
